<compile_context>
chip_gen: v7x
topology: tpu7x:2x2x1
jax: 0.10.0
libtpu: 0.0.40
codegen_flags: <defaults>
</compile_context>

<pallas_src>
import functools

import jax
import jax.numpy as jnp
from jax.experimental import pallas as pl
from jax.experimental.pallas import tpu as pltpu

_LANES = 128                 # last dim multiple of 128 -> unmasked, lane-dense vst
_SUBLANES = 8
_ROW_ALIGN = 2 * _SUBLANES   # 16: safe sublane multiple for f32 and bf16 tiles
_SMALL_BYTES = 2 << 20       # inputs at/below this run the single fused kernel
_SMALL_VMEM_F32 = 2 << 20    # cap on the fused block's padded f32 VMEM footprint


def _round_up(a, b):
    return ((a + b - 1) // b) * b


def _default_max_tile_rows():
    """Rows per (rows, 128) tile, per TPU generation.

    v5e/v6e: 2 MiB f32 tiles -- pass 2 double-buffers in+out (8 MiB), safely under
    v5e's 16 MiB default scoped VMEM and already ~roofline at 0.8-1.4 TB/s.
    v7x:     4 MiB tiles (16 MiB double-buffered, under the 32 MiB scoped default)
    to amortize the ~0.35 us/grid-step overhead against ~3.2 TB/s HBM.
    """
    try:
        kind = jax.devices()[0].device_kind.lower()
    except Exception:
        kind = ""
    return 8192 if "7" in kind else 4096


# ------------------------------------------------------------------------ kernels
def _fused_center_kernel(x_ref, o_ref, *, inv_n):
    """Small-input path: whole array is one VMEM block; reduce+subtract fused."""
    xv = x_ref[...].astype(jnp.float32)
    mean = jnp.sum(xv) * inv_n                 # inv_n folds at compile time
    o_ref[...] = (xv - mean).astype(o_ref.dtype)


def _partial_sum_kernel(x_ref, acc_ref, *, tiles_per_core, tile_rows, valid_rows):
    """Pass 1: per-lane partial sums into a per-core resident (8,128) f32 block.

    Grid = (2, tiles_per_core): axis 0 is "parallel" so v7x shards the reduction
    across both TensorCores (each core owns its own output block); axis 1 is the
    serial accumulation axis.
    """
    @pl.when(pl.program_id(1) == 0)
    def _():
        acc_ref[...] = jnp.zeros_like(acc_ref)

    t = pl.program_id(0) * tiles_per_core + pl.program_id(1)  # global tile index
    xv = x_ref[...].astype(jnp.float32)
    # Rows at/after `valid_rows` are ragged-tail / core-split padding rows whose
    # block reads are unspecified, so they must not reach the sum.
    limit = valid_rows - t * tile_rows
    row_ids = jax.lax.broadcasted_iota(jnp.int32, xv.shape, 0)
    xv = jnp.where(row_ids < limit, xv, 0.0)
    # Per-lane accumulation: VPU adds only (no per-tile cross-lane XLU reduce),
    # and better summation accuracy for very large n. (1,128) broadcasts over the
    # (8,128) block, so every row of the block holds the same per-lane sums.
    acc_ref[...] += jnp.sum(xv, axis=0, keepdims=True)


def _center_kernel(sum_ref, x_ref, o_ref, *, inv_n):
    """Pass 2: o = x - sum * (1/N); sum is a (1,1) SMEM scalar."""
    mean = sum_ref[0, 0] * inv_n
    o_ref[...] = (x_ref[...].astype(jnp.float32) - mean).astype(o_ref.dtype)


# ------------------------------------------------------------------------ wrapper
def centered_layer(x, *, small_bytes=_SMALL_BYTES, max_tile_rows=None):
    """x - x.mean()  (mean over every element; PyTorch CenteredLayer semantics).

    `small_bytes` / `max_tile_rows` are test hooks to force specific code paths.
    """
    orig_shape = x.shape
    orig_dtype = x.dtype
    n = int(x.size)
    if n == 0:
        return x
    itemsize = jnp.dtype(orig_dtype).itemsize
    inv_n = float(1.0 / n)

    # ---- Small-input fast path: one fused kernel, one dispatch ------------------
    if n % _LANES == 0:
        small_shape = (n // _LANES, _LANES)                 # lane-dense 2D view
    elif x.ndim >= 2:
        small_shape = (n // orig_shape[-1], orig_shape[-1])
    else:
        small_shape = (1, n)
    padded_f32 = (_round_up(small_shape[0], _SUBLANES)
                  * _round_up(small_shape[1], _LANES) * 4)  # fused block footprint
    if (n * itemsize <= small_bytes and padded_f32 <= _SMALL_VMEM_F32) \
            or n <= _ROW_ALIGN * _LANES:
        out2d = pl.pallas_call(
            functools.partial(_fused_center_kernel, inv_n=inv_n),
            out_shape=jax.ShapeDtypeStruct(small_shape, orig_dtype),
        )(x.reshape(small_shape))
        return out2d.reshape(orig_shape)

    # ---- Large input: two pipelined passes over a lane-dense (rows, 128) view ---
    if n % _LANES == 0:
        rows = n // _LANES
        x2d = x.reshape(rows, _LANES)          # metadata-only reshape: no pad copy
        need_slice = False
    else:
        # TODO(synk): rare non-128-aligned large input still pays a pad+slice copy.
        rows = _round_up(pl.cdiv(n, _LANES), _ROW_ALIGN)
        x2d = jnp.pad(x.reshape(-1), (0, rows * _LANES - n)).reshape(rows, _LANES)
        need_slice = True

    max_rows = max_tile_rows if max_tile_rows is not None else _default_max_tile_rows()
    max_rows = max(_ROW_ALIGN, (max_rows // _ROW_ALIGN) * _ROW_ALIGN)
    # Never larger than the array's row count (ragged tail handled by masking).
    tile_rows = max(_ROW_ALIGN, min(max_rows, (rows // _ROW_ALIGN) * _ROW_ALIGN))
    num_tiles = pl.cdiv(rows, tile_rows)
    tiles_per_core = pl.cdiv(num_tiles, 2)     # leading size-2 "parallel" axis

    # ---- Pass 1: partial-sum reduction, megacore-sharded on v7x -----------------
    psums = pl.pallas_call(
        functools.partial(_partial_sum_kernel, tiles_per_core=tiles_per_core,
                          tile_rows=tile_rows, valid_rows=rows),
        out_shape=jax.ShapeDtypeStruct((2 * _SUBLANES, _LANES), jnp.float32),
        grid_spec=pl.GridSpec(
            grid=(2, tiles_per_core),
            in_specs=[pl.BlockSpec(
                (tile_rows, _LANES),
                # Clamp so padding tiles (odd tile counts) never request an
                # out-of-range block; their data is masked to zero in-kernel.
                lambda c, i: (jnp.minimum(c * tiles_per_core + i, num_tiles - 1), 0))],
            out_specs=pl.BlockSpec((_SUBLANES, _LANES), lambda c, i: (c, 0)),
        ),
        compiler_params=pltpu.CompilerParams(
            dimension_semantics=("parallel", "arbitrary")),
        cost_estimate=pl.CostEstimate(
            flops=n, transcendentals=0, bytes_accessed=n * itemsize),
    )(x2d)
    # Tiny finish in XLA: rows within each per-core block are identical, so take
    # row 0 of each core's block, add, and reduce 128 lanes.
    total_sum = jnp.sum(psums[0, :] + psums[_SUBLANES, :]).reshape(1, 1)

    # ---- Pass 2: tiled subtract; independent tiles -> "parallel" (megacore) -----
    out2d = pl.pallas_call(
        functools.partial(_center_kernel, inv_n=inv_n),
        out_shape=jax.ShapeDtypeStruct((rows, _LANES), orig_dtype),
        grid_spec=pl.GridSpec(
            grid=(num_tiles,),
            in_specs=[
                pl.BlockSpec(memory_space=pltpu.MemorySpace.SMEM),     # (1,1) sum
                pl.BlockSpec((tile_rows, _LANES), lambda i: (i, 0)),   # x tile
            ],
            out_specs=pl.BlockSpec((tile_rows, _LANES), lambda i: (i, 0)),
        ),
        compiler_params=pltpu.CompilerParams(dimension_semantics=("parallel",)),
        cost_estimate=pl.CostEstimate(
            flops=n, transcendentals=0, bytes_accessed=2 * n * itemsize + 4),
    )(total_sum, x2d)

    if need_slice:
        return out2d.reshape(-1)[:n].reshape(orig_shape)
    return out2d.reshape(orig_shape)


if __name__ == "__main__":
    key = jax.random.PRNGKey(0)
    k1, k2, k3 = jax.random.split(key, 3)

    # Small input consistent with the module's 2D usage -> fused single-kernel path.
    x = jax.random.normal(k1, (8, 32), dtype=jnp.float32)
    out = jax.block_until_ready(centered_layer(x))
    ref = x - jnp.mean(x)
    assert out.shape == x.shape and out.dtype == x.dtype
    assert jnp.allclose(out, ref, atol=1e-5), "mismatch vs reference (fused path)"
    assert jnp.abs(jnp.mean(out)) < 1e-5

    # Exact toy case from the PyTorch script: ones(1, 4) -> zeros.
    x_ones = jnp.ones((1, 4), dtype=jnp.float32)
    out_ones = jax.block_until_ready(centered_layer(x_ones))
    assert jnp.allclose(out_ones, jnp.zeros((1, 4), jnp.float32), atol=1e-6)

    # Exercise the tiled two-pass path (lane-aligned, ragged tail + megacore split)
    # by forcing it via the test hooks at a still-small size.
    x_big = jax.random.normal(k2, (380, 256), dtype=jnp.float32)
    out_big = jax.block_until_ready(
        centered_layer(x_big, small_bytes=0, max_tile_rows=256))
    assert out_big.shape == x_big.shape and out_big.dtype == x_big.dtype
    assert jnp.allclose(out_big, x_big - jnp.mean(x_big), atol=1e-4), \
        "mismatch vs reference (two-pass path)"

    # Exercise the rare non-128-aligned fallback (pad + slice) path.
    x_odd = jax.random.normal(k3, (33, 100), dtype=jnp.float32)
    out_odd = jax.block_until_ready(
        centered_layer(x_odd, small_bytes=0, max_tile_rows=256))
    assert out_odd.shape == x_odd.shape and out_odd.dtype == x_odd.dtype
    assert jnp.allclose(out_odd, x_odd - jnp.mean(x_odd), atol=1e-4), \
        "mismatch vs reference (pad fallback path)"

    print("KERNEL_OK")
</pallas_src>

<mosaic_0001>
module attributes {stable_mosaic.version = 11 : i64} {
  func.func @_fused_center_kernel(%arg0: memref<2x128xf32, #tpu.memory_space<vmem>>, %arg1: memref<2x128xf32, #tpu.memory_space<vmem>>) attributes {dimension_semantics = [], scalar_prefetch = 0 : i64, scratch_operands = 0 : i64, tpu.core_type = #tpu.core_type<tc>} {
    %c0 = arith.constant 0 : index
    %c0_0 = arith.constant 0 : index
    %0 = vector.load %arg0[%c0, %c0_0] : memref<2x128xf32, #tpu.memory_space<vmem>>, vector<2x128xf32>
    %1 = vector.shape_cast %0 : vector<2x128xf32> to vector<1x2x128xf32>
    %cst = arith.constant dense<0.000000e+00> : vector<1xf32>
    %2 = vector.multi_reduction <add>, %1, %cst [1, 2] : vector<1x2x128xf32> to vector<1xf32>
    %3 = vector.shape_cast %2 : vector<1xf32> to vector<1x1x1xf32>
    %4 = vector.extract %3[0, 0, 0] : f32 from vector<1x1x1xf32>
    %cst_1 = arith.constant 3.906250e-03 : f32
    %5 = arith.mulf %4, %cst_1 : f32
    %6 = vector.broadcast %5 : f32 to vector<2x128xf32>
    %7 = arith.subf %0, %6 : vector<2x128xf32>
    %c0_2 = arith.constant 0 : index
    %c0_3 = arith.constant 0 : index
    %8 = vector.load %arg1[%c0_2, %c0_3] : memref<2x128xf32, #tpu.memory_space<vmem>>, vector<2x128xf32>
    tpu.vector_store %arg1[%c0_2, %c0_3], %7 {strides = array<i32>} : memref<2x128xf32, #tpu.memory_space<vmem>>, vector<2x128xf32>,
    return
  }
}

</mosaic_0001>

<bundles_post_ra>
// kernel: tpu_custom_call.1
= control target key start
LH: loop header
LB: loop body
LE: loop exit
PB: predicated region body
PF: predicated region fallthrough
CT: control target
= control target key end

     0   :  { %6 = vsyncpa [#allocation3], 0  ;;  %s140_s0 = inlined_call_operand.hbm [shape: f32[2,128], index: 0, kind: input, shape index: {}]   ;;  %s141_s1 = inlined_call_operand.hbm [shape: f32[2,128], index: 1, kind: output, shape index: {}]  }
   0x1   :  { %7 = vsyncpa [#allocation4], 0  ;;  %s104_s6 = smov [#allocation2]   ;;  %s56_s10 = scalar_lea.hbm %s140_s0, 32 }
   0x2   :  { %s14_s7 = sshll.u32 %s104_s6, 4  ;;  %p57_p0 = scmp.ne.s32.totalorder %s140_s0, %s56_s10  ;;  %s15_s7 = int_to_ptr.vmem [resolvable:$true] %s14_s7 }
   0x3   :  { %p60_p1 = scmp.lt.u32.totalorder %s56_s10, %s140_s0 }
   0x5   :  { %p62_p2 = pnand %p60_p1, %p57_p0 }
   0x7   :  { %65 = shalt.err (!%p62_p2)
}
   0x8   :  { %s66_s15 = scalar_lea.vmem %s15_s7, 32  ;;  %p71_p4 = scmp.lt.s32.totalorder %s15_s7, %s15_s7 }
   0x9   :  { %p67_p3 = scmp.ne.s32.totalorder %s15_s7, %s66_s15  ;;  %p72_p5 = scmp.lt.s32.totalorder %s66_s15, %s66_s15 }
   0xb   :  { %p73_p6 = por %p72_p5, %p71_p4 }
   0xd   :  { %p74_p7 = pnand %p73_p6, %p67_p3 }
   0xf   :  { %77 = shalt.err (!%p74_p7)
}
  0x10   :  { %17 = dma.hbm_to_vmem [thread:$0]  %s140_s0, 32, %s15_s7, [#allocation3]  }
  0x11   :  { %100 = dma.done.wait [#allocation3], 32  }
  0x12   :  { %101 = vsyncadd [#allocation3], 4294967264  ;;  %vm22_vm0 = vcmask 1041408   ;;  %v21_v0 = vld [vmem:[#allocation2] sm:$0x3]  ;;  %s105_s20 = smov [#allocation5]  }
  0x13   :  { %v23_v1 = vsel %vm22_vm0, %v21_v0, 0.0  ;;  %s43_s21 = sshll.u32 %s105_s20, 4  ;;  %s44_s21 = int_to_ptr.vmem [resolvable:$true] %s43_s21 }
  0x14   :  { %24 = vadd.xlane.f32.xlu0 %v23_v1  ;;  %s78_s0 = scalar_lea.vmem %s44_s21, 32  ;;  %p83_p9 = scmp.lt.s32.totalorder %s44_s21, %s44_s21 }
  0x15   :  { %p79_p8 = scmp.ne.s32.totalorder %s44_s21, %s78_s0  ;;  %p84_p10 = scmp.lt.s32.totalorder %s78_s0, %s78_s0 }
  0x17   :  { %p85_p11 = por %p84_p10, %p83_p9 }
  0x19   :  { %p86_p12 = pnand %p85_p11, %p79_p8 }
  0xa1   :  { %v25_v2 = vpop.xlane.xlu0 %24 }
  0xa2   :  { %v26_v3 = vrot.slane %v25_v2, 4 }
  0xa4   :  { %v27_v4 = vadd.f32 %v26_v3, %v25_v2 }
  0xa6   :  { %v28_v5 = vrot.slane %v27_v4, 2 }
  0xa8   :  { %v29_v6 = vadd.f32 %v28_v5, %v27_v4 }
  0xaa   :  { %v30_v7 = vrot.slane %v29_v6, 1 }
  0xac   :  { %v31_v8 = vadd.f32 %v30_v7, %v29_v6 }
  0xae   :  { %52 = vpush %v31_v8 }
  0xdf   :  { %s53_s18 = spop %52 }
  0xe0   :  { %s33_s19 = smul.f32 0.00390625, %s53_s18 }
  0xe2   :  { %v34_v9 = vstv %s33_s19 }
  0xe3   :  { %v35_v10 = vsub.f32 %v21_v0, %v34_v9 }
  0xe5   :  { %36 = vst [vmem:[#allocation5] sm:$0x3] %v35_v10 }
  0xe6   :  { %89 = shalt.err (!%p86_p12)
}
  0xe7   :  { %s90_s24 = scalar_lea.hbm %s141_s1, 32 }
  0xe8   :  { %p91_p13 = scmp.ne.s32.totalorder %s141_s1, %s90_s24  ;;  %p94_p0 = scmp.lt.u32.totalorder %s90_s24, %s141_s1 }
  0xea   :  { %p96_p1 = pnand %p94_p0, %p91_p13 }
  0xec   :  { %99 = shalt.err (!%p96_p1)
}
  0xed   :  { %46 = dma.vmem_to_hbm [thread:$0]  %s44_s21, 32, %s141_s1, [#allocation4]  }
  0xee   :  { %102 = dma.done.wait [#allocation4], 32  }
  0xef   :  { %103 = vsyncadd [#allocation4], 4294967264 }
  0xf0   :  { %50 = vsyncpa [#allocation3], 1 }
  0xf1   :  { %51 = vsyncpa [#allocation4], 1 }

</bundles_post_ra>
